<compile_context>
chip_gen: v7x
topology: tpu7x:2x2x1
jax: 0.10.0
libtpu: 0.0.40
codegen_flags: <defaults>
</compile_context>

<pallas_src>
import math
from functools import partial

import jax
import jax.numpy as jnp
from jax.experimental import pallas as pl
from jax.experimental.pallas import tpu as pltpu


# ----------------------------------------------------------------------------
# Pallas kernel: fused (x @ W_feat + interp @ P_image + bias) -> ReLU
# ----------------------------------------------------------------------------
def _spm_bottleneck_kernel(x_ref, it_ref, p_ref, w_ref, b_ref, o_ref, *,
                           tm, compute_dtype, resident_interp):
    # x_ref : (tm, Ck)   feature rows for this (image, M-tile), native dtype (cast here)
    # it_ref: (Mp, Sk) if resident_interp else (tm, Sk)  bilinear interp weights
    # p_ref : (Sk, Nn)   per-image prior contributions (pool->stage conv->W slice)
    # w_ref : (Ck, Nn)   bottleneck weight slice for the identity pathway (VMEM-resident)
    # b_ref : (1, Nn)    bias, f32 (VMEM-resident)
    # o_ref : (tm, Nn)   output tile, out_dtype
    x = x_ref[...].astype(compute_dtype)
    acc = jnp.dot(x, w_ref[...], preferred_element_type=jnp.float32)
    if resident_interp:
        row0 = pl.multiple_of(pl.program_id(1) * tm, 8)
        it = it_ref[pl.ds(row0, tm), :]
    else:
        it = it_ref[...]
    acc = acc + jnp.dot(it, p_ref[...], preferred_element_type=jnp.float32)
    acc = acc + b_ref[...]
    o_ref[...] = jnp.maximum(acc, 0.0).astype(o_ref.dtype)


def _round_up(v, m):
    return ((v + m - 1) // m) * m


def _vmem_budget_and_limit():
    """Generation-aware VMEM numbers: (tile-selection budget, vmem_limit_bytes)."""
    mib = 1024 * 1024
    phys = None
    try:
        info = pltpu.get_tpu_info()
        phys = getattr(info, "vmem_capacity_bytes", None)
    except Exception:
        phys = None
    if phys is None:
        phys = 64 * mib            # conservative fallback: assume smallest (v7x-class) VMEM
    if phys >= 96 * mib:           # v5e / v6e: 128 MiB physical VMEM
        return 64 * mib, 80 * mib
    return 32 * mib, 44 * mib      # v7x: 64 MiB physical; leave Mosaic scratch headroom


def _choose_tile_m(mp, ck, sk, nn, batch, x_isz, cd_isz, out_isz, budget):
    """Largest tm (multiple of 8 that DIVIDES mp) whose VMEM footprint fits `budget`.

    Counts: double-buffered streamed x / out tiles, double-buffered resident
    W / P / bias (and interp when resident), the in-kernel f32 matmul accumulators
    and the compute-dtype cast of the x tile.  Returns (tm, resident_interp).
    """
    resident_interp = 2 * mp * sk * cd_isz <= budget // 4
    resident = 2 * (ck * nn * cd_isz + sk * nn * cd_isz + nn * 4)
    if resident_interp:
        resident += 2 * mp * sk * cd_isz

    k = mp // 8
    divs = sorted({d for i in range(1, math.isqrt(k) + 1) if k % i == 0
                   for d in (i, k // i)}, reverse=True)
    cands = [8 * d for d in divs]
    if batch == 1 and mp > 8:
        # keep >= 2 grid points so both v7x TensorCores get work
        cands = [t for t in cands if t < mp] or [8]

    for tm in cands:
        streamed = 2 * tm * (ck * x_isz + nn * out_isz)            # x in + out (2 bufs each)
        if not resident_interp:
            streamed += 2 * tm * sk * cd_isz                        # streamed interp tile
        temps = tm * ck * cd_isz + 2 * tm * nn * 4                  # in-kernel cast + f32 accs
        if resident + streamed + temps <= budget:
            return tm, resident_interp
    return cands[-1], resident_interp


def spm_bottleneck_pallas(x, interp, p_all, w_feats, bias, *,
                          compute_dtype=jnp.bfloat16, out_dtype=jnp.float32):
    """relu(x @ w_feats + interp @ p_all[b] + bias), tiled over (batch, M).

    x       : (B, HW, C)  raw features (NHWC flattened), native dtype (streamed as-is)
    interp  : (HW, S)     bilinear interpolation weights (shared across batch)
    p_all   : (B, S, O)   per-image prior contributions
    w_feats : (C, O)
    bias    : (O,)
    returns : (B, HW, O) in out_dtype
    """
    batch, hw, c = x.shape
    s_tot = interp.shape[1]
    o = w_feats.shape[1]
    cd = jnp.dtype(compute_dtype).itemsize
    ob = jnp.dtype(out_dtype).itemsize

    # --- padding policy: only where it is free at real scale ---
    mp = _round_up(hw, 8)                              # sublane alignment; usually == hw
    ck = c if c % 128 == 0 else _round_up(c, 128)      # typical backbones: already aligned
    sk = _round_up(s_tot, 128)                         # tiny, batch-invariant
    nn = o if o % 128 == 0 else _round_up(o, 128)      # default out_features=1024: aligned

    if mp != hw or ck != c:
        # Rare at real scale; fuse pad + cast into one pass so the kernel then streams
        # compute_dtype rows.  When no pad is needed, x is streamed in its native dtype
        # and cast in-kernel (no wrapper pass over the big tensor at all).
        x = jnp.pad(x, ((0, 0), (0, mp - hw), (0, ck - c))).astype(compute_dtype)
    x_isz = jnp.dtype(x.dtype).itemsize

    interp = jnp.pad(interp, ((0, mp - hw), (0, sk - s_tot))).astype(compute_dtype)
    p_all = jnp.pad(p_all, ((0, 0), (0, sk - s_tot), (0, nn - o))).astype(compute_dtype)
    w_feats = jnp.pad(w_feats, ((0, ck - c), (0, nn - o))).astype(compute_dtype)
    bias2 = jnp.pad(bias, (0, nn - o)).reshape(1, nn).astype(jnp.float32)

    budget, vmem_limit = _vmem_budget_and_limit()
    tm, resident_interp = _choose_tile_m(mp, ck, sk, nn, batch, x_isz, cd, ob, budget)

    if resident_interp:
        # Batch-invariant: constant index map -> fetched into VMEM once for the grid.
        it_spec = pl.BlockSpec((mp, sk), lambda bi, mi: (0, 0))
    else:
        it_spec = pl.BlockSpec((tm, sk), lambda bi, mi: (mi, 0))

    grid = (batch, mp // tm)
    kernel = partial(_spm_bottleneck_kernel, tm=tm, compute_dtype=compute_dtype,
                     resident_interp=resident_interp)

    flops = 2 * batch * mp * (ck + sk) * nn
    it_bytes = interp.size * cd if resident_interp else batch * mp * sk * cd
    bytes_accessed = (batch * mp * ck * x_isz + it_bytes + p_all.size * cd
                      + w_feats.size * cd + bias2.size * 4 + batch * mp * nn * ob)

    out = pl.pallas_call(
        kernel,
        out_shape=jax.ShapeDtypeStruct((batch, mp, nn), out_dtype),
        grid=grid,
        in_specs=[
            pl.BlockSpec((None, tm, ck), lambda bi, mi: (bi, mi, 0)),   # x rows (streamed)
            it_spec,                                                    # interp weights
            pl.BlockSpec((None, sk, nn), lambda bi, mi: (bi, 0, 0)),    # per-image P
            pl.BlockSpec((ck, nn), lambda bi, mi: (0, 0)),              # W_feat (resident)
            pl.BlockSpec((1, nn), lambda bi, mi: (0, 0)),               # bias   (resident)
        ],
        out_specs=pl.BlockSpec((None, tm, nn), lambda bi, mi: (bi, mi, 0)),
        compiler_params=pltpu.CompilerParams(
            dimension_semantics=("parallel", "parallel"),
            vmem_limit_bytes=vmem_limit),
        cost_estimate=pl.CostEstimate(flops=flops, transcendentals=0,
                                      bytes_accessed=bytes_accessed),
    )(x, interp, p_all, w_feats, bias2)

    if mp != hw or nn != o:
        out = out[:, :hw, :o]      # only in the ragged case; aligned shapes avoid this pass
    return out


# ----------------------------------------------------------------------------
# Plain-JAX glue matching PyTorch semantics exactly (all tiny tensors)
# ----------------------------------------------------------------------------
def _pool_bins(in_size, s):
    """torch.nn.AdaptiveAvgPool2d bins: start=floor(i*H/s), end=ceil((i+1)*H/s)."""
    return [(int(math.floor(i * in_size / s)), int(math.ceil((i + 1) * in_size / s)))
            for i in range(s)]


def adaptive_avg_pool_nhwc(x, out_size):
    """x: (N, H, W, C) -> (N, s, s, C), identical bins to AdaptiveAvgPool2d."""
    _, H, W, _ = x.shape
    rows = []
    for hs, he in _pool_bins(H, out_size):
        cols = [jnp.mean(x[:, hs:he, ws:we, :], axis=(1, 2))
                for ws, we in _pool_bins(W, out_size)]
        rows.append(jnp.stack(cols, axis=1))        # (N, s, C)
    return jnp.stack(rows, axis=1)                  # (N, s, s, C)


def adaptive_avg_pool_nchw(x, out_size):
    """Reference-path pooling on NCHW."""
    _, _, H, W = x.shape
    rows = []
    for hs, he in _pool_bins(H, out_size):
        cols = [jnp.mean(x[:, :, hs:he, ws:we], axis=(2, 3))
                for ws, we in _pool_bins(W, out_size)]
        rows.append(jnp.stack(cols, axis=-1))
    return jnp.stack(rows, axis=-2)                 # (N, C, s, s)


def _interp_matrix(out_size, in_size):
    """(out_size, in_size) 1-D bilinear-resize weights, align_corners=False (PyTorch)."""
    scale = in_size / out_size
    dst = jnp.arange(out_size, dtype=jnp.float32)
    src = jnp.maximum((dst + 0.5) * scale - 0.5, 0.0)
    i0 = jnp.minimum(jnp.floor(src).astype(jnp.int32), in_size - 1)
    i1 = jnp.minimum(i0 + 1, in_size - 1)
    lam = src - i0.astype(jnp.float32)
    m0 = jax.nn.one_hot(i0, in_size, dtype=jnp.float32) * (1.0 - lam)[:, None]
    m1 = jax.nn.one_hot(i1, in_size, dtype=jnp.float32) * lam[:, None]
    return m0 + m1


def bilinear_resize_nchw(x, out_h, out_w):
    """F.interpolate(mode='bilinear', align_corners=False) — reference path only."""
    _, _, in_h, in_w = x.shape

    def src_index(out_size, in_size):
        scale = in_size / out_size
        dst = jnp.arange(out_size, dtype=jnp.float32)
        src = jnp.maximum((dst + 0.5) * scale - 0.5, 0.0)
        i0 = jnp.minimum(jnp.floor(src).astype(jnp.int32), in_size - 1)
        i1 = jnp.minimum(i0 + 1, in_size - 1)
        lam = src - i0.astype(jnp.float32)
        return i0, i1, lam

    h0, h1, lh = src_index(out_h, in_h)
    w0, w1, lw = src_index(out_w, in_w)
    x_h = (x[:, :, h0, :] * (1.0 - lh)[None, None, :, None]
           + x[:, :, h1, :] * lh[None, None, :, None])
    return (x_h[:, :, :, w0] * (1.0 - lw)[None, None, None, :]
            + x_h[:, :, :, w1] * lw[None, None, None, :])


def conv1x1_nchw(x, weight_oc):
    return jnp.einsum("nchw,oc->nohw", x, weight_oc)


# ----------------------------------------------------------------------------
# SPM forward (Pallas hot path) and pure-JAX reference
# ----------------------------------------------------------------------------
def spm_forward(feats, params, sizes=(1, 2, 3, 6), *, compute_dtype=jnp.bfloat16,
                out_dtype=jnp.float32, layout="NCHW"):
    """layout="NCHW": feats (N,C,H,W) -> (N,O,H,W) (PyTorch-compatible, one transpose
    pass each way).  layout="NHWC": feats (N,H,W,C) -> (N,H,W,O), no full-resolution
    transpose passes at all."""
    if layout == "NCHW":
        n, c, h, w = feats.shape
        x_nhwc = jnp.transpose(feats, (0, 2, 3, 1))     # one pass; use layout="NHWC" to skip
    elif layout == "NHWC":
        n, h, w, c = feats.shape
        x_nhwc = feats
    else:
        raise ValueError(f"unknown layout {layout!r}")

    hw = h * w
    n_stages = len(sizes)
    W_b = params["bottleneck_w"]              # (O, (n_stages+1)*C)
    bias = params["bottleneck_b"]             # (O,)
    o_feat = W_b.shape[0]

    # ---- tiny per-stage work in plain JAX (<= 6x6 tensors) ----
    interp_blocks, p_blocks = [], []
    for idx, s in enumerate(sizes):
        pooled = adaptive_avg_pool_nhwc(x_nhwc, s)                      # (n, s, s, c)
        pooled_flat = pooled.reshape(n, s * s, c)
        conved = jnp.einsum("npc,dc->npd", pooled_flat, params["stage_w"][idx])
        w_slice = W_b[:, idx * c:(idx + 1) * c]                         # (O, C)
        p_blocks.append(jnp.einsum("npd,od->npo", conved, w_slice))     # (n, s*s, O)
        mh = _interp_matrix(h, s)
        mw = _interp_matrix(w, s)
        interp_blocks.append(jnp.einsum("hp,wq->hwpq", mh, mw).reshape(hw, s * s))

    interp = jnp.concatenate(interp_blocks, axis=1)                     # (hw, S=50)
    p_all = jnp.concatenate(p_blocks, axis=1)                           # (n, S, O)
    w_feats = W_b[:, n_stages * c:].T                                   # (C, O)

    # identity pathway: the only full-resolution activation fed to the kernel
    x = x_nhwc.reshape(n, hw, c)                                        # (n, hw, C)

    out = spm_bottleneck_pallas(x, interp, p_all, w_feats, bias,
                                compute_dtype=compute_dtype, out_dtype=out_dtype)
    out = out.reshape(n, h, w, o_feat)
    if layout == "NCHW":
        out = jnp.transpose(out, (0, 3, 1, 2))    # match the PyTorch module's NCHW output
    return out


def spm_reference(feats, params, sizes=(1, 2, 3, 6)):
    """Pure-JAX reference (original concat formulation) for correctness checking."""
    n, c, h, w = feats.shape
    priors = []
    for idx, s in enumerate(sizes):
        pooled = adaptive_avg_pool_nchw(feats, s)
        conved = conv1x1_nchw(pooled, params["stage_w"][idx])
        priors.append(bilinear_resize_nchw(conved, h, w))
    priors.append(feats)
    cat = jnp.concatenate(priors, axis=1)
    out = jnp.einsum("nkhw,ok->nohw", cat, params["bottleneck_w"])
    out = out + params["bottleneck_b"][None, :, None, None]
    return jnp.maximum(out, 0.0)


def init_params(key, features, out_features, sizes=(1, 2, 3, 6)):
    keys = jax.random.split(key, len(sizes) + 2)
    stage_w = [0.1 * jax.random.normal(keys[i], (features, features), dtype=jnp.float32)
               for i in range(len(sizes))]
    k_in = features * (len(sizes) + 1)
    bottleneck_w = 0.1 * jax.random.normal(keys[len(sizes)], (out_features, k_in),
                                           dtype=jnp.float32)
    bottleneck_b = 0.1 * jax.random.normal(keys[len(sizes) + 1], (out_features,),
                                           dtype=jnp.float32)
    return {"stage_w": stage_w, "bottleneck_w": bottleneck_w, "bottleneck_b": bottleneck_b}


if __name__ == "__main__":
    # Small shapes consistent with the module: batch=2, channels=4, spatial=16x16.
    batch, features, H, W = 2, 4, 16, 16
    out_features = 128      # reduced from the default 1024 to keep the example small
    sizes = (1, 2, 3, 6)

    key = jax.random.PRNGKey(0)
    k_x, k_p = jax.random.split(key)
    feats = jax.random.normal(k_x, (batch, features, H, W), dtype=jnp.float32)
    params = init_params(k_p, features, out_features, sizes)

    ref = jax.block_until_ready(spm_reference(feats, params, sizes))

    # f32 kernel path: validates the interpolation-factorized decomposition tightly.
    out_f32 = jax.block_until_ready(
        jax.jit(partial(spm_forward, sizes=sizes, compute_dtype=jnp.float32,
                        out_dtype=jnp.float32))(feats, params))
    assert out_f32.shape == (batch, out_features, H, W)
    assert jnp.allclose(out_f32, ref, atol=1e-4, rtol=1e-4), \
        "f32 Pallas output mismatch vs reference"

    # bf16 MXU compute + bf16 output stream (halved output HBM traffic).
    out_bf16 = jax.block_until_ready(
        jax.jit(partial(spm_forward, sizes=sizes, compute_dtype=jnp.bfloat16,
                        out_dtype=jnp.bfloat16))(feats, params))
    assert out_bf16.shape == (batch, out_features, H, W)
    assert out_bf16.dtype == jnp.bfloat16
    assert jnp.allclose(out_bf16.astype(jnp.float32), ref, atol=7e-2, rtol=7e-2), \
        "bf16 Pallas output mismatch vs reference"

    # NHWC end-to-end path: no full-resolution transpose passes around the kernel.
    feats_nhwc = jnp.transpose(feats, (0, 2, 3, 1))
    out_nhwc = jax.block_until_ready(
        jax.jit(partial(spm_forward, sizes=sizes, compute_dtype=jnp.float32,
                        out_dtype=jnp.float32, layout="NHWC"))(feats_nhwc, params))
    assert out_nhwc.shape == (batch, H, W, out_features)
    assert jnp.allclose(jnp.transpose(out_nhwc, (0, 3, 1, 2)), ref, atol=1e-4, rtol=1e-4), \
        "NHWC Pallas output mismatch vs reference"

    print("KERNEL_OK")
</pallas_src>

<mosaic_0001>
module attributes {stable_mosaic.version = 11 : i64} {
  func.func @_spm_bottleneck_kernel(%arg0: i32, %arg1: i32, %arg2: memref<1x256x128xf32, #tpu.memory_space<vmem>>, %arg3: memref<256x128xf32, #tpu.memory_space<vmem>>, %arg4: memref<1x128x128xf32, #tpu.memory_space<vmem>>, %arg5: memref<128x128xf32, #tpu.memory_space<vmem>>, %arg6: memref<1x128xf32, #tpu.memory_space<vmem>>, %arg7: memref<1x256x128xf32, #tpu.memory_space<vmem>>) attributes {dimension_semantics = [#tpu.dimension_semantics<parallel>, #tpu.dimension_semantics<parallel>], iteration_bounds = array<i64: 2, 1>, scalar_prefetch = 0 : i64, scratch_operands = 0 : i64, tpu.core_type = #tpu.core_type<tc>, window_params = [{transform_indices = @transform_0, window_bounds = array<i64: 1, 256, 128>}, {pipeline_mode = #tpu.pipeline_mode<synchronous>, transform_indices = @transform_1, window_bounds = array<i64: 256, 128>}, {transform_indices = @transform_2, window_bounds = array<i64: 1, 128, 128>}, {pipeline_mode = #tpu.pipeline_mode<synchronous>, transform_indices = @transform_3, window_bounds = array<i64: 128, 128>}, {pipeline_mode = #tpu.pipeline_mode<synchronous>, transform_indices = @transform_4, window_bounds = array<i64: 1, 128>}, {transform_indices = @transform_5, window_bounds = array<i64: 1, 256, 128>}]} {
    %c0 = arith.constant 0 : index
    %c0_0 = arith.constant 0 : index
    %c0_1 = arith.constant 0 : index
    %0 = vector.load %arg2[%c0, %c0_0, %c0_1] : memref<1x256x128xf32, #tpu.memory_space<vmem>>, vector<1x256x128xf32>
    %1 = vector.shape_cast %0 : vector<1x256x128xf32> to vector<256x128xf32>
    %c0_2 = arith.constant 0 : index
    %c0_3 = arith.constant 0 : index
    %2 = vector.load %arg5[%c0_2, %c0_3] : memref<128x128xf32, #tpu.memory_space<vmem>>, vector<128x128xf32>
    %cst = arith.constant dense<0.000000e+00> : vector<256x128xf32>
    %3 = tpu.matmul %1, %2, %cst {dimension_numbers = #tpu.dot_dimension_numbers<[1], [0], [0], [1], [0, 0, 1, 1], [], []>} : vector<256x128xf32>, vector<128x128xf32>, vector<256x128xf32> -> vector<256x128xf32>
    %c256_i32 = arith.constant 256 : i32
    %4 = arith.muli %arg1, %c256_i32 : i32
    %5 = tpu.assume_multiple %4, 8 : i32
    %6 = arith.index_cast %5 : i32 to index
    %c0_4 = arith.constant 0 : index
    %7 = vector.load %arg3[%6, %c0_4] : memref<256x128xf32, #tpu.memory_space<vmem>>, vector<256x128xf32>
    %c0_5 = arith.constant 0 : index
    %c0_6 = arith.constant 0 : index
    %c0_7 = arith.constant 0 : index
    %8 = vector.load %arg4[%c0_5, %c0_6, %c0_7] : memref<1x128x128xf32, #tpu.memory_space<vmem>>, vector<1x128x128xf32>
    %9 = vector.shape_cast %8 : vector<1x128x128xf32> to vector<128x128xf32>
    %cst_8 = arith.constant dense<0.000000e+00> : vector<256x128xf32>
    %10 = tpu.matmul %7, %9, %cst_8 {dimension_numbers = #tpu.dot_dimension_numbers<[1], [0], [0], [1], [0, 0, 1, 1], [], []>} : vector<256x128xf32>, vector<128x128xf32>, vector<256x128xf32> -> vector<256x128xf32>
    %11 = arith.addf %3, %10 : vector<256x128xf32>
    %c0_9 = arith.constant 0 : index
    %c0_10 = arith.constant 0 : index
    %12 = vector.load %arg6[%c0_9, %c0_10] : memref<1x128xf32, #tpu.memory_space<vmem>>, vector<1x128xf32>
    %13 = vector.broadcast %12 : vector<1x128xf32> to vector<256x128xf32>
    %14 = arith.addf %11, %13 : vector<256x128xf32>
    %cst_11 = arith.constant 0.000000e+00 : f32
    %15 = vector.broadcast %cst_11 : f32 to vector<256x128xf32>
    %16 = arith.maximumf %14, %15 : vector<256x128xf32>
    %c0_12 = arith.constant 0 : index
    %c0_13 = arith.constant 0 : index
    %c0_14 = arith.constant 0 : index
    %17 = vector.load %arg7[%c0_12, %c0_13, %c0_14] : memref<1x256x128xf32, #tpu.memory_space<vmem>>, vector<1x256x128xf32>
    %18 = vector.shape_cast %17 : vector<1x256x128xf32> to vector<256x128xf32>
    %19 = vector.shape_cast %16 : vector<256x128xf32> to vector<1x256x128xf32>
    tpu.vector_store %arg7[%c0_12, %c0_13, %c0_14], %19 {strides = array<i32>} : memref<1x256x128xf32, #tpu.memory_space<vmem>>, vector<1x256x128xf32>,
    return
  }
  func.func @transform_0(%arg0: i32, %arg1: i32) -> (i32, i32, i32) {
    %c0_i32 = arith.constant 0 : i32
    %c0_i32_0 = arith.constant 0 : i32
    return %arg0, %arg1, %c0_i32 : i32, i32, i32
  }
  func.func @transform_1(%arg0: i32, %arg1: i32) -> (i32, i32) {
    %c0_i32 = arith.constant 0 : i32
    %c0_i32_0 = arith.constant 0 : i32
    %c0_i32_1 = arith.constant 0 : i32
    return %c0_i32, %c0_i32_0 : i32, i32
  }
  func.func @transform_2(%arg0: i32, %arg1: i32) -> (i32, i32, i32) {
    %c0_i32 = arith.constant 0 : i32
    %c0_i32_0 = arith.constant 0 : i32
    %c0_i32_1 = arith.constant 0 : i32
    return %arg0, %c0_i32, %c0_i32_0 : i32, i32, i32
  }
  func.func @transform_3(%arg0: i32, %arg1: i32) -> (i32, i32) {
    %c0_i32 = arith.constant 0 : i32
    %c0_i32_0 = arith.constant 0 : i32
    %c0_i32_1 = arith.constant 0 : i32
    return %c0_i32, %c0_i32_0 : i32, i32
  }
  func.func @transform_4(%arg0: i32, %arg1: i32) -> (i32, i32) {
    %c0_i32 = arith.constant 0 : i32
    %c0_i32_0 = arith.constant 0 : i32
    %c0_i32_1 = arith.constant 0 : i32
    return %c0_i32, %c0_i32_0 : i32, i32
  }
  func.func @transform_5(%arg0: i32, %arg1: i32) -> (i32, i32, i32) {
    %c0_i32 = arith.constant 0 : i32
    %c0_i32_0 = arith.constant 0 : i32
    return %arg0, %arg1, %c0_i32 : i32, i32, i32
  }
}

</mosaic_0001>

<bundles_post_ra>
// kernel: spm_forward.1
= control target key start
LH: loop header
LB: loop body
LE: loop exit
PB: predicated region body
PF: predicated region fallthrough
CT: control target
= control target key end

     0   :  { %10 = vsyncpa [#allocation3], 0  ;;  %s1965_s0 = inlined_call_operand.vmem [shape: f32[2,256,128], index: 0, kind: input, shape index: {}]   ;;  %s1966_s1 = inlined_call_operand.vmem [shape: f32[256,128], index: 1, kind: input, shape index: {}]   ;;  %s1967_s2 = inlined_call_operand.vmem [shape: f32[2,128,128], index: 2, kind: input, shape index: {}]   ;;  %s1968_s3 = inlined_call_operand.vmem [shape: f32[128,128], index: 3, kind: input, shape index: {}]   ;;  %s1969_s4 = inlined_call_operand.vmem [shape: f32[1,128], index: 4, kind: input, shape index: {}]   ;;  %s1970_s5 = inlined_call_operand.hbm [shape: f32[2,256,128], index: 5, kind: output, shape index: {}]  }
   0x1   :  { %12 = vsyncpa [#allocation3 + $0x1], 0  ;;  %s1575_s18 = smov 0   ;;  %s1577_s19 = smov 0  }
   0x2   :  { %s1579_s20 = smov 0   ;;  %s1581_s21 = smov 0  }
   0x3   :  { %s1583_s22 = smov 0   ;;  %s1585_s23 = smov 0  }
   0x4 LB: > { %s1034_s24 = sadd.s32 4294967295, %s1540_s23   ;;  %s1035_s25 = sadd.s32 4294967294, %s1540_s23   ;;  %s1540_s23 = sphi %s1585_s23, %s18_s23   ;;  %s1536_s22 = sphi %s1583_s22, %s1977_s22   ;;  %s1532_s21 = sphi %s1581_s21, %s1976_s21   ;;  %s1528_s20 = sphi %s1579_s20, %s1975_s20   ;;  %s1524_s19 = sphi %s1577_s19, %s1974_s19   ;;  %s1520_s18 = sphi %s1575_s18, %s1973_s18  }
   0x5   : > { %s30_s26 = sadd.s32 1, %s1536_s22  ;;  %s156_s27 = sadd.s32 1, %s1528_s20 }
   0x6   : > { %p32_p0 = scmp.ge.s32.totalorder %s30_s26, 2  ;;  %p166_p1 = scmp.ne.s32.totalorder %s1528_s20, %s1524_s19 }
   0x7   : > { %p167_p2 = scmp.eq.s32.totalorder %s1034_s24, 1  ;;  %p172_p3 = scmp.ne.s32.totalorder %s1524_s19, %s1520_s18 }
   0x8   : > { %s1979_s26 = smov (%p32_p0, %s30_s26), 0  ;;  %p173_p5 = scmp.eq.s32.totalorder %s1035_s25, 1 }
   0x9   : > { %p1615_p4 = por %p167_p2, %p166_p1  ;;  %s151_s29 = ssub.s32 %s1536_s22, %s1979_s26 }
   0xa   : > { %p1038_p6 = scmp.ge.s32.totalorder %s1540_s23, 1  ;;  %p154_p7 = scmp.eq.s32.totalorder %s151_s29, 0 }
   0xb   : > { %p1622_p8 = por %p173_p5, %p172_p3  ;;  %p221_p9 = scmp.lt.s32.totalorder %s1540_s23, 3 }
   0xc   : > { %s1628_s6 = scalar_select %p154_p7, %s1528_s20, %s156_s27  }
   0xd   : > { %p222_p10 = pnand %p1038_p6, %p221_p9 }
   0xe   : > { %v306_v0 = vld [vmem:[%s1968_s3] sm:$0xff] (!%p222_p10)  ;;  %v307_v1 = vld [vmem:[%s1968_s3 + $0x8] sm:$0xff] (!%p222_p10)  ;;  %p259_p11 = scmp.lt.s32.totalorder (!%p222_p10), %s1532_s21, 1  ;;  %v308_v2 = vld [vmem:[%s1968_s3 + $0x10] sm:$0xff] (!%p222_p10)  ;;  %s1052_s17 = sshll.u32 (!%p222_p10), %s1532_s21, 12 }
   0xf   : > { %225 = sbr.rel (%p222_p10) target bundleno = 355 (0x163), region = 40  ;;  %v1341_v3 = vpack.c.bf16 (!%p222_p10), %v307_v1, %v306_v0  ;;  %v309_v4 = vld [vmem:[%s1968_s3 + $0x18] sm:$0xff] (!%p222_p10)  ;;  %v310_v6 = vld [vmem:[%s1968_s3 + $0x20] sm:$0xff] (!%p222_p10)  ;;  %v311_v7 = vld [vmem:[%s1968_s3 + $0x28] sm:$0xff] (!%p222_p10)  ;;  %s1911_s8 = scalar_lea.hbm (!%p222_p10), %s1970_s5, %s1052_s17 }
  0x10   : > { %v1345_v5 = vpack.c.bf16 (!%p222_p10), %v309_v4, %v308_v2  ;;  %v1349_v8 = vpack.c.bf16 (!%p222_p10), %v311_v7, %v310_v6  ;;  %v312_v9 = vld [vmem:[%s1968_s3 + $0x30] sm:$0xff] (!%p222_p10)  ;;  %v313_v10 = vld [vmem:[%s1968_s3 + $0x38] sm:$0xff] (!%p222_p10)  ;;  %v324_v11 = vld [vmem:[%s1966_s1] sm:$0xff] (!%p222_p10) }
  0x11   : > { %1342 = vmatprep.subr.bf16.mxu0 (!%p222_p10), %v1341_v3  ;;  %1181 = vmatprep.mubr.f32.mxu1 (!%p222_p10), %v324_v11  ;;  %v1353_v20 = vpack.c.bf16 (!%p222_p10), %v313_v10, %v312_v9  ;;  %v314_v21 = vld [vmem:[%s1968_s3 + $0x40] sm:$0xff] (!%p222_p10)  ;;  %v315_v22 = vld [vmem:[%s1968_s3 + $0x48] sm:$0xff] (!%p222_p10)  ;;  %v316_v28 = vld [vmem:[%s1968_s3 + $0x50] sm:$0xff] (!%p222_p10) }
  0x12   : > { %1344 = vmatpush3.bf16.msra.mxu0 (!%p222_p10), %v1341_v3  ;;  %v1357_v27 = vpack.c.bf16 (!%p222_p10), %v315_v22, %v314_v21  ;;  %v317_v29 = vld [vmem:[%s1968_s3 + $0x58] sm:$0xff] (!%p222_p10)  ;;  %v318_v34 = vld [vmem:[%s1968_s3 + $0x60] sm:$0xff] (!%p222_p10)  ;;  %v319_v35 = vld [vmem:[%s1968_s3 + $0x68] sm:$0xff] (!%p222_p10) }
  0x13   : > { %1346 = vmatprep.subr.bf16.mxu0 (!%p222_p10), %v1345_v5  ;;  %v1361_v33 = vpack.c.bf16 (!%p222_p10), %v317_v29, %v316_v28  ;;  %v1365_v39 = vpack.c.bf16 (!%p222_p10), %v319_v35, %v318_v34  ;;  %v320_v40 = vld [vmem:[%s1968_s3 + $0x70] sm:$0xff] (!%p222_p10)  ;;  %v321_v41 = vld [vmem:[%s1968_s3 + $0x78] sm:$0xff] (!%p222_p10)  ;;  %v325_v54 = vld [vmem:[%s1966_s1 + $0x8] sm:$0xff] (!%p222_p10) }
  0x14   : > { %v1369_v45 = vpack.c.bf16 (!%p222_p10), %v321_v41, %v320_v40  ;;  %v326_v55 = vld [vmem:[%s1966_s1 + $0x10] sm:$0xff] (!%p222_p10)  ;;  %v327_v58 = vld [vmem:[%s1966_s1 + $0x18] sm:$0xff] (!%p222_p10)  ;;  %v328_v59 = vld [vmem:[%s1966_s1 + $0x20] sm:$0xff] (!%p222_p10) }
  0x15   : > { %v329_v62 = vld [vmem:[%s1966_s1 + $0x28] sm:$0xff] (!%p222_p10)  ;;  %v330_v63 = vld [vmem:[%s1966_s1 + $0x30] sm:$0xff] (!%p222_p10)  ;;  %v331_v2 = vld [vmem:[%s1966_s1 + $0x38] sm:$0xff] (!%p222_p10) }
  0x16   : > { %s260_s15 = scalar_select %p259_p11, %s1532_s21, 1  ;;  %1348 = vmatpush3.bf16.msra.mxu0 %v1345_v5  ;;  %v332_v3 = vld [vmem:[%s1966_s1 + $0x40] sm:$0xff]  ;;  %v333_v6 = vld [vmem:[%s1966_s1 + $0x48] sm:$0xff]  ;;  %v334_v7 = vld [vmem:[%s1966_s1 + $0x50] sm:$0xff] }
  0x17   : > { %1350 = vmatprep.subr.bf16.mxu0 %v1349_v8  ;;  %v335_v10 = vld [vmem:[%s1966_s1 + $0x58] sm:$0xff]  ;;  %v336_v11 = vld [vmem:[%s1966_s1 + $0x60] sm:$0xff]  ;;  %v341_v22 = vld [vmem:[%s1966_s1 + $0x88] sm:$0xff] }
  0x18   : > { %s1051_s27 = sshll.u32 %s260_s15, 7  ;;  %s1050_s29 = sshll.u32 %s260_s15, 8  ;;  %v347_v34 = vld [vmem:[%s1966_s1 + $0xb8] sm:$0xff]  ;;  %v348_v35 = vld [vmem:[%s1966_s1 + $0xc0] sm:$0xff] }
  0x19   : > { %s1653_s9 = scalar_lea.vmem %s1967_s2, %s1051_s27  ;;  %s1671_s24 = scalar_lea.vmem %s1965_s0, %s1050_s29 }
  0x1a   : > { %v356_v12 = vld [vmem:[%s1653_s9] sm:$0xff]  ;;  %v357_v13 = vld [vmem:[%s1653_s9 + $0x8] sm:$0xff]  ;;  %v358_v14 = vld [vmem:[%s1653_s9 + $0x10] sm:$0xff]  ;;  %1352 = vmatpush3.bf16.msra.mxu0 %v1349_v8  ;;  %s1542_s29 = smov [#allocation2]  }
  0x1b   : > { %v1309_v15 = vpack.c.bf16 %v357_v13, %v356_v12  ;;  %v359_v16 = vld [vmem:[%s1653_s9 + $0x18] sm:$0xff]  ;;  %v360_v18 = vld [vmem:[%s1653_s9 + $0x20] sm:$0xff]  ;;  %v361_v19 = vld [vmem:[%s1653_s9 + $0x28] sm:$0xff]  ;;  %1354 = vmatprep.subr.bf16.mxu0 %v1353_v20  ;;  %s1466_s10 = sshll.u32 %s1542_s29, 4  ;;  %s1467_s10 = int_to_ptr.vmem [resolvable:$false] %s1466_s10 }
  0x1c   : > { %v1313_v17 = vpack.c.bf16 %v359_v16, %v358_v14  ;;  %v1317_v23 = vpack.c.bf16 %v361_v19, %v360_v18  ;;  %v274_v24 = vld [vmem:[%s1671_s24] sm:$0xff]  ;;  %v362_v25 = vld [vmem:[%s1653_s9 + $0x30] sm:$0xff]  ;;  %v363_v26 = vld [vmem:[%s1653_s9 + $0x38] sm:$0xff]  ;;  %s1468_s11 = scalar_lea.vmem %s1467_s10, 8192 }
  0x1d   : > { %1310 = vmatprep.subr.bf16.mxu1 %v1309_v15  ;;  %1261 = vmatprep.mubr.f32.mxu0 %v274_v24  ;;  %v1321_v30 = vpack.c.bf16 %v363_v26, %v362_v25  ;;  %v364_v31 = vld [vmem:[%s1653_s9 + $0x40] sm:$0xff]  ;;  %v365_v32 = vld [vmem:[%s1653_s9 + $0x48] sm:$0xff]  ;;  %v366_v37 = vld [vmem:[%s1653_s9 + $0x50] sm:$0xff] }
  0x1e   : > { %1312 = vmatpush3.bf16.msra.mxu1 %v1309_v15  ;;  %1356 = vmatpush3.bf16.msra.mxu0 %v1353_v20  ;;  %v1325_v36 = vpack.c.bf16 %v365_v32, %v364_v31  ;;  %v367_v38 = vld [vmem:[%s1653_s9 + $0x58] sm:$0xff]  ;;  %v368_v43 = vld [vmem:[%s1653_s9 + $0x60] sm:$0xff]  ;;  %v369_v44 = vld [vmem:[%s1653_s9 + $0x68] sm:$0xff] }
  0x1f   : > { %1314 = vmatprep.subr.bf16.mxu1 %v1313_v17  ;;  %1358 = vmatprep.subr.bf16.mxu0 %v1357_v27  ;;  %v1329_v42 = vpack.c.bf16 %v367_v38, %v366_v37  ;;  %v1333_v46 = vpack.c.bf16 %v369_v44, %v368_v43  ;;  %v370_v47 = vld [vmem:[%s1653_s9 + $0x70] sm:$0xff]  ;;  %v371_v48 = vld [vmem:[%s1653_s9 + $0x78] sm:$0xff]  ;;  %v275_v50 = vld [vmem:[%s1671_s24 + $0x8] sm:$0xff] }
  0x20   : > { %v1337_v49 = vpack.c.bf16 %v371_v48, %v370_v47  ;;  %v276_v51 = vld [vmem:[%s1671_s24 + $0x10] sm:$0xff]  ;;  %v277_v52 = vld [vmem:[%s1671_s24 + $0x18] sm:$0xff]  ;;  %v278_v53 = vld [vmem:[%s1671_s24 + $0x20] sm:$0xff] }
  0x21   : > { %v279_v56 = vld [vmem:[%s1671_s24 + $0x28] sm:$0xff]  ;;  %v280_v57 = vld [vmem:[%s1671_s24 + $0x30] sm:$0xff]  ;;  %v281_v60 = vld [vmem:[%s1671_s24 + $0x38] sm:$0xff] }
  0x22   : > { %1316 = vmatpush3.bf16.msra.mxu1 %v1313_v17  ;;  %1360 = vmatpush3.bf16.msra.mxu0 %v1357_v27  ;;  %v282_v61 = vld [vmem:[%s1671_s24 + $0x40] sm:$0xff]  ;;  %v283_v0 = vld [vmem:[%s1671_s24 + $0x48] sm:$0xff]  ;;  %v284_v1 = vld [vmem:[%s1671_s24 + $0x50] sm:$0xff] }
  0x23   : > { %1318 = vmatprep.subr.bf16.mxu1 %v1317_v23  ;;  %1362 = vmatprep.subr.bf16.mxu0 %v1361_v33  ;;  %v285_v4 = vld [vmem:[%s1671_s24 + $0x58] sm:$0xff]  ;;  %v286_v5 = vld [vmem:[%s1671_s24 + $0x60] sm:$0xff]  ;;  %v287_v8 = vld [vmem:[%s1671_s24 + $0x68] sm:$0xff] }
  0x24   : > { %v288_v9 = vld [vmem:[%s1671_s24 + $0x70] sm:$0xff]  ;;  %v289_v12 = vld [vmem:[%s1671_s24 + $0x78] sm:$0xff]  ;;  %v290_v13 = vld [vmem:[%s1671_s24 + $0x80] sm:$0xff] }
  0x25   : > { %v337_v14 = vld [vmem:[%s1966_s1 + $0x68] sm:$0xff]  ;;  %v338_v15 = vld [vmem:[%s1966_s1 + $0x70] sm:$0xff]  ;;  %v339_v18 = vld [vmem:[%s1966_s1 + $0x78] sm:$0xff] }
  0x26   : > { %1320 = vmatpush3.bf16.msra.mxu1 %v1317_v23  ;;  %1364 = vmatpush3.bf16.msra.mxu0 %v1361_v33  ;;  %v291_v16 = vld [vmem:[%s1671_s24 + $0x88] sm:$0xff]  ;;  %v292_v17 = vld [vmem:[%s1671_s24 + $0x90] sm:$0xff]  ;;  %v340_v19 = vld [vmem:[%s1966_s1 + $0x80] sm:$0xff] }
  0x27   : > { %1322 = vmatprep.subr.bf16.mxu1 %v1321_v30  ;;  %1366 = vmatprep.subr.bf16.mxu0 %v1365_v39  ;;  %v293_v20 = vld [vmem:[%s1671_s24 + $0x98] sm:$0xff]  ;;  %v294_v21 = vld [vmem:[%s1671_s24 + $0xa0] sm:$0xff]  ;;  %v342_v23 = vld [vmem:[%s1966_s1 + $0x90] sm:$0xff] }
  0x28   : > { %v295_v24 = vld [vmem:[%s1671_s24 + $0xa8] sm:$0xff]  ;;  %v296_v25 = vld [vmem:[%s1671_s24 + $0xb0] sm:$0xff]  ;;  %v343_v26 = vld [vmem:[%s1966_s1 + $0x98] sm:$0xff] }
  0x29   : > { %v344_v27 = vld [vmem:[%s1966_s1 + $0xa0] sm:$0xff]  ;;  %v297_v28 = vld [vmem:[%s1671_s24 + $0xb8] sm:$0xff]  ;;  %v346_v31 = vld [vmem:[%s1966_s1 + $0xb0] sm:$0xff] }
  0x2a   : > { %1324 = vmatpush3.bf16.msra.mxu1 %v1321_v30  ;;  %1368 = vmatpush3.bf16.msra.mxu0 %v1365_v39  ;;  %v298_v29 = vld [vmem:[%s1671_s24 + $0xc0] sm:$0xff]  ;;  %v345_v30 = vld [vmem:[%s1966_s1 + $0xa8] sm:$0xff]  ;;  %v300_v33 = vld [vmem:[%s1671_s24 + $0xd0] sm:$0xff] }
  0x2b   : > { %1326 = vmatprep.subr.bf16.mxu1 %v1325_v36  ;;  %1370 = vmatprep.subr.bf16.mxu0 %v1369_v45  ;;  %v299_v32 = vld [vmem:[%s1671_s24 + $0xc8] sm:$0xff]  ;;  %v302_v37 = vld [vmem:[%s1671_s24 + $0xe0] sm:$0xff]  ;;  %v350_v39 = vld [vmem:[%s1966_s1 + $0xd0] sm:$0xff] }
  0x2c   : > { %v349_v38 = vld [vmem:[%s1966_s1 + $0xc8] sm:$0xff]  ;;  %v304_v41 = vld [vmem:[%s1671_s24 + $0xf0] sm:$0xff]  ;;  %v352_v43 = vld [vmem:[%s1966_s1 + $0xe0] sm:$0xff] }
  0x2d   : > { %v303_v40 = vld [vmem:[%s1671_s24 + $0xe8] sm:$0xff]  ;;  %v305_v44 = vld [vmem:[%s1671_s24 + $0xf8] sm:$0xff] }
  0x2e   : > { %1328 = vmatpush3.bf16.msra.mxu1 %v1325_v36  ;;  %1372 = vmatpush3.bf16.msra.mxu0 %v1369_v45  ;;  %v301_v36 = vld [vmem:[%s1671_s24 + $0xd8] sm:$0xff]  ;;  %v353_v45 = vld [vmem:[%s1966_s1 + $0xe8] sm:$0xff]  ;;  %s255_s24 = sand.u32 1, %s1524_s19  }
  0x2f   : > { %1330 = vmatprep.subr.bf16.mxu1 %v1329_v42  ;;  %v355_v47 = vld [vmem:[%s1966_s1 + $0xf8] sm:$0xff]  ;;  %s1039_s15 = sshll.u32 %s255_s24, 8  ;;  %s1919_s21 = scalar_lea.sflag [#allocation3], %s255_s24 }
  0x30   : > { %s1844_s16 = scalar_lea.vmem [#allocation2], %s1039_s15 }
  0x31   : > { %1262 = vmatmul.mubr.f32.vlgmr.msra.gmra.mrb[0].mxu0 %v275_v50  ;;  %s941_s25 = sshll.u32 %s1844_s16, 4  ;;  %s1913_s25 = int_to_ptr.vmem [resolvable:$true] %s941_s25 }
  0x32   : > { %1332 = vmatpush3.bf16.msra.mxu1 %v1329_v42  ;;  %1264 = vmatprep.mubr.f32.mxu0 %v276_v51  ;;  %v351_v42 = vld [vmem:[%s1966_s1 + $0xd8] sm:$0xff]  ;;  %s1462_s9 = scalar_lea.vmem %s1913_s25, 4096  ;;  %p1469_p1 = scmp.lt.s32.totalorder %s1913_s25, %s1467_s10 }
  0x33   : > { %1334 = vmatprep.subr.bf16.mxu1 %v1333_v46  ;;  %p1463_p12 = scmp.ne.s32.totalorder %s1913_s25, %s1462_s9  ;;  %p1470_p2 = scmp.lt.s32.totalorder %s1468_s11, %s1462_s9 }
  0x35   : > { %1265 = vmatmul.mubr.f32.gmra.mrb[2].mxu0 %v277_v52  ;;  %p1464_p13 = pnand %p1463_p12, %p1615_p4  ;;  %p1471_p3 = por %p1470_p2, %p1469_p1 }
  0x36   : > { %1336 = vmatpush3.bf16.msra.mxu1 %v1333_v46  ;;  %1267 = vmatprep.mubr.f32.mxu0 %v278_v53  ;;  %v354_v46 = vld [vmem:[%s1966_s1 + $0xf0] sm:$0xff]  ;;  %v1838_v53 = vld [vmem:[%s1969_s4] ss:$0 sm:$0xff] }
  0x37   : > { %1338 = vmatprep.subr.bf16.mxu1 %v1337_v49  ;;  %p1465_p0 = pneg %p1464_p13 }
  0x39   : > { %1268 = vmatmul.mubr.f32.gmra.mrb[4].mxu0 %v279_v56  ;;  %p1472_p5 = pnand %p1471_p3, %p1465_p0 }
  0x3a   : > { %1340 = vmatpush3.bf16.msra.mxu1 %v1337_v49  ;;  %1270 = vmatprep.mubr.f32.mxu0 %v280_v57 }
  0x3d   : > { %1182 = vmatmul.mubr.f32.vlgmr.msra.gmra.mrb[0].mxu1 %v325_v54  ;;  %1271 = vmatmul.mubr.f32.gmra.mrb[6].mxu0 %v281_v60 }
  0x3e   : > { %1184 = vmatprep.mubr.f32.mxu1 %v326_v55  ;;  %1273 = vmatprep.mubr.f32.mxu0 %v282_v61 }
  0x41   : > { %1185 = vmatmul.mubr.f32.gmra.mrb[2].mxu1 %v327_v58  ;;  %1274 = vmatmul.mubr.f32.gmra.mrb[8].mxu0 %v283_v0 }
  0x42   : > { %1187 = vmatprep.mubr.f32.mxu1 %v328_v59  ;;  %1276 = vmatprep.mubr.f32.mxu0 %v284_v1 }
  0x45   : > { %1188 = vmatmul.mubr.f32.gmra.mrb[4].mxu1 %v329_v62  ;;  %1277 = vmatmul.mubr.f32.gmra.mrb[10].mxu0 %v285_v4 }
  0x46   : > { %1190 = vmatprep.mubr.f32.mxu1 %v330_v63  ;;  %1279 = vmatprep.mubr.f32.mxu0 %v286_v5 }
  0x49   : > { %1191 = vmatmul.mubr.f32.gmra.mrb[6].mxu1 %v331_v2  ;;  %1280 = vmatmul.mubr.f32.gmra.mrb[12].mxu0 %v287_v8 }
  0x4a   : > { %1193 = vmatprep.mubr.f32.mxu1 %v332_v3  ;;  %1282 = vmatprep.mubr.f32.mxu0 %v288_v9 }
  0x4d   : > { %1194 = vmatmul.mubr.f32.gmra.mrb[8].mxu1 %v333_v6  ;;  %1283 = vmatmul.mubr.f32.gmra.mrb[14].mxu0 %v289_v12 }
  0x4e   : > { %1196 = vmatprep.mubr.f32.mxu1 %v334_v7  ;;  %1285 = vmatprep.mubr.f32.mxu0 %v290_v13 }
  0x51   : > { %1197 = vmatmul.mubr.f32.gmra.mrb[10].mxu1 %v335_v10  ;;  %1286 = vmatmul.mubr.f32.gmra.mrb[16].mxu0 %v291_v16 }
  0x52   : > { %1199 = vmatprep.mubr.f32.mxu1 %v336_v11  ;;  %1288 = vmatprep.mubr.f32.mxu0 %v292_v17 }
  0x55   : > { %1200 = vmatmul.mubr.f32.gmra.mrb[12].mxu1 %v337_v14  ;;  %1289 = vmatmul.mubr.f32.gmra.mrb[18].mxu0 %v293_v20 }
  0x56   : > { %1202 = vmatprep.mubr.f32.mxu1 %v338_v15  ;;  %1291 = vmatprep.mubr.f32.mxu0 %v294_v21 }
  0x59   : > { %1203 = vmatmul.mubr.f32.gmra.mrb[14].mxu1 %v339_v18  ;;  %1292 = vmatmul.mubr.f32.gmra.mrb[20].mxu0 %v295_v24 }
  0x5a   : > { %1205 = vmatprep.mubr.f32.mxu1 %v340_v19  ;;  %1294 = vmatprep.mubr.f32.mxu0 %v296_v25 }
  0x5d   : > { %1206 = vmatmul.mubr.f32.gmra.mrb[16].mxu1 %v341_v22  ;;  %1295 = vmatmul.mubr.f32.gmra.mrb[22].mxu0 %v297_v28 }
  0x5e   : > { %1208 = vmatprep.mubr.f32.mxu1 %v342_v23  ;;  %1297 = vmatprep.mubr.f32.mxu0 %v298_v29 }
  0x61   : > { %1209 = vmatmul.mubr.f32.gmra.mrb[18].mxu1 %v343_v26  ;;  %1298 = vmatmul.mubr.f32.gmra.mrb[24].mxu0 %v299_v32 }
  0x62   : > { %1211 = vmatprep.mubr.f32.mxu1 %v344_v27  ;;  %1300 = vmatprep.mubr.f32.mxu0 %v300_v33 }
  0x65   : > { %1212 = vmatmul.mubr.f32.gmra.mrb[20].mxu1 %v345_v30  ;;  %1301 = vmatmul.mubr.f32.gmra.mrb[26].mxu0 %v301_v36 }
  0x66   : > { %1214 = vmatprep.mubr.f32.mxu1 %v346_v31  ;;  %1303 = vmatprep.mubr.f32.mxu0 %v302_v37 }
  0x69   : > { %1215 = vmatmul.mubr.f32.gmra.mrb[22].mxu1 %v347_v34  ;;  %1304 = vmatmul.mubr.f32.gmra.mrb[28].mxu0 %v303_v40 }
  0x6a   : > { %1217 = vmatprep.mubr.f32.mxu1 %v348_v35  ;;  %1306 = vmatprep.mubr.f32.mxu0 %v304_v41 }
  0x6d   : > { %1218 = vmatmul.mubr.f32.gmra.mrb[24].mxu1 %v349_v38  ;;  %1307 = vmatmul.mubr.f32.gmra.mrb[30].mxu0 %v305_v44 }
  0x6e   : > { %1220 = vmatprep.mubr.f32.mxu1 %v350_v39 }
  0x71   : > { %1221 = vmatmul.mubr.f32.gmra.mrb[26].mxu1 %v351_v42 }
  0x72   : > { %1223 = vmatprep.mubr.f32.mxu1 %v352_v43 }
  0x75   : > { %1224 = vmatmul.mubr.f32.gmra.mrb[28].mxu1 %v353_v45 }
  0x76   : > { %1226 = vmatprep.mubr.f32.mxu1 %v354_v46 }
  0x79   : > { %1227 = vmatmul.mubr.f32.gmra.mrb[30].mxu1 %v355_v47 }
 0x104   : > { %v1263_v48 = vpop.f32.mrb[0].mxu0 }
 0x105   : > { %v663_v49 = vpop.f32.mrb[1].mxu0 }
 0x108   : > { %v1266_v50 = vpop.f32.mrb[2].mxu0 }
 0x109   : > { %v673_v51 = vpop.f32.mrb[3].mxu0 }
 0x10c   : > { %v1269_v57 = vpop.f32.mrb[4].mxu0 }
 0x10d   : > { %v683_v59 = vpop.f32.mrb[5].mxu0 }
 0x110   : > { %v1183_v52 = vpop.f32.mrb[0].mxu1  ;;  %v1272_v3 = vpop.f32.mrb[6].mxu0 }
 0x111   : > { %v669_v54 = vadd.f32 %v1263_v48, %v1183_v52  ;;  %v438_v55 = vpop.f32.mrb[1].mxu1  ;;  %v693_v5 = vpop.f32.mrb[7].mxu0 }
 0x112   : > { %v664_v56 = vadd.f32 %v663_v49, %v438_v55 }
 0x113   : > { %v830_v58 = vadd.f32 %v1838_v53, %v669_v54 }
 0x114   : > { %v829_v60 = vadd.f32 %v1838_v53, %v664_v56  ;;  %v1186_v61 = vpop.f32.mrb[2].mxu1  ;;  %v1275_v13 = vpop.f32.mrb[8].mxu0 }
 0x115   : > { %v862_v62 = vmax.f32 %v830_v58, 0.0  ;;  %v679_v63 = vadd.f32 %v1266_v50, %v1186_v61  ;;  %v448_v0 = vpop.f32.mrb[3].mxu1  ;;  %v703_v15 = vpop.f32.mrb[9].mxu0 }
 0x116   : > { %v861_v1 = vmax.f32 %v829_v60, 0.0  ;;  %v674_v2 = vadd.f32 %v673_v51, %v448_v0 }
 0x117   : > { %894 = vst [vmem:[%s1844_s16 + $0x8] sm:$0xff] %v862_v62  ;;  %v832_v4 = vadd.f32 %v1838_v53, %v679_v63 }
 0x118   : > { %893 = vst [vmem:[%s1844_s16] sm:$0xff] %v861_v1  ;;  %v831_v6 = vadd.f32 %v1838_v53, %v674_v2  ;;  %v1189_v7 = vpop.f32.mrb[4].mxu1  ;;  %v1278_v23 = vpop.f32.mrb[10].mxu0 }
 0x119   : > { %v864_v8 = vmax.f32 %v832_v4, 0.0  ;;  %v689_v9 = vadd.f32 %v1269_v57, %v1189_v7  ;;  %v458_v10 = vpop.f32.mrb[5].mxu1  ;;  %v713_v25 = vpop.f32.mrb[11].mxu0 }
 0x11a   : > { %v863_v11 = vmax.f32 %v831_v6, 0.0  ;;  %v684_v12 = vadd.f32 %v683_v59, %v458_v10 }
 0x11b   : > { %896 = vst [vmem:[%s1844_s16 + $0x18] sm:$0xff] %v864_v8  ;;  %v834_v14 = vadd.f32 %v1838_v53, %v689_v9 }
 0x11c   : > { %895 = vst [vmem:[%s1844_s16 + $0x10] sm:$0xff] %v863_v11  ;;  %v833_v16 = vadd.f32 %v1838_v53, %v684_v12  ;;  %v1192_v17 = vpop.f32.mrb[6].mxu1  ;;  %v1281_v33 = vpop.f32.mrb[12].mxu0 }
 0x11d   : > { %v866_v18 = vmax.f32 %v834_v14, 0.0  ;;  %v699_v19 = vadd.f32 %v1272_v3, %v1192_v17  ;;  %v468_v20 = vpop.f32.mrb[7].mxu1  ;;  %v723_v35 = vpop.f32.mrb[13].mxu0 }
 0x11e   : > { %v865_v21 = vmax.f32 %v833_v16, 0.0  ;;  %v694_v22 = vadd.f32 %v693_v5, %v468_v20 }
 0x11f   : > { %898 = vst [vmem:[%s1844_s16 + $0x28] sm:$0xff] %v866_v18  ;;  %v836_v24 = vadd.f32 %v1838_v53, %v699_v19 }
 0x120   : > { %897 = vst [vmem:[%s1844_s16 + $0x20] sm:$0xff] %v865_v21  ;;  %v835_v26 = vadd.f32 %v1838_v53, %v694_v22  ;;  %v1195_v27 = vpop.f32.mrb[8].mxu1  ;;  %v1284_v43 = vpop.f32.mrb[14].mxu0 }
 0x121   : > { %v868_v28 = vmax.f32 %v836_v24, 0.0  ;;  %v709_v29 = vadd.f32 %v1275_v13, %v1195_v27  ;;  %v478_v30 = vpop.f32.mrb[9].mxu1  ;;  %v733_v45 = vpop.f32.mrb[15].mxu0 }
 0x122   : > { %v867_v31 = vmax.f32 %v835_v26, 0.0  ;;  %v704_v32 = vadd.f32 %v703_v15, %v478_v30 }
 0x123   : > { %900 = vst [vmem:[%s1844_s16 + $0x38] sm:$0xff] %v868_v28  ;;  %v838_v34 = vadd.f32 %v1838_v53, %v709_v29 }
 0x124   : > { %899 = vst [vmem:[%s1844_s16 + $0x30] sm:$0xff] %v867_v31  ;;  %v837_v36 = vadd.f32 %v1838_v53, %v704_v32  ;;  %v1198_v37 = vpop.f32.mrb[10].mxu1  ;;  %v1287_v54 = vpop.f32.mrb[16].mxu0 }
 0x125   : > { %v870_v38 = vmax.f32 %v838_v34, 0.0  ;;  %v719_v39 = vadd.f32 %v1278_v23, %v1198_v37  ;;  %v488_v40 = vpop.f32.mrb[11].mxu1  ;;  %v743_v56 = vpop.f32.mrb[17].mxu0 }
 0x126   : > { %v869_v41 = vmax.f32 %v837_v36, 0.0  ;;  %v714_v42 = vadd.f32 %v713_v25, %v488_v40 }
 0x127   : > { %902 = vst [vmem:[%s1844_s16 + $0x48] sm:$0xff] %v870_v38  ;;  %v840_v44 = vadd.f32 %v1838_v53, %v719_v39 }
 0x128   : > { %901 = vst [vmem:[%s1844_s16 + $0x40] sm:$0xff] %v869_v41  ;;  %v839_v46 = vadd.f32 %v1838_v53, %v714_v42  ;;  %v1201_v47 = vpop.f32.mrb[12].mxu1  ;;  %v1290_v0 = vpop.f32.mrb[18].mxu0 }
 0x129   : > { %v872_v48 = vmax.f32 %v840_v44, 0.0  ;;  %v729_v49 = vadd.f32 %v1281_v33, %v1201_v47  ;;  %v498_v50 = vpop.f32.mrb[13].mxu1  ;;  %v753_v2 = vpop.f32.mrb[19].mxu0 }
 0x12a   : > { %v871_v51 = vmax.f32 %v839_v46, 0.0  ;;  %v724_v52 = vadd.f32 %v723_v35, %v498_v50 }
 0x12b   : > { %904 = vst [vmem:[%s1844_s16 + $0x58] sm:$0xff] %v872_v48  ;;  %v842_v55 = vadd.f32 %v1838_v53, %v729_v49 }
 0x12c   : > { %903 = vst [vmem:[%s1844_s16 + $0x50] sm:$0xff] %v871_v51  ;;  %v841_v57 = vadd.f32 %v1838_v53, %v724_v52  ;;  %v1204_v58 = vpop.f32.mrb[14].mxu1  ;;  %v1293_v10 = vpop.f32.mrb[20].mxu0 }
 0x12d   : > { %v874_v59 = vmax.f32 %v842_v55, 0.0  ;;  %v739_v60 = vadd.f32 %v1284_v43, %v1204_v58  ;;  %v508_v61 = vpop.f32.mrb[15].mxu1  ;;  %v763_v12 = vpop.f32.mrb[21].mxu0 }
 0x12e   : > { %v873_v62 = vmax.f32 %v841_v57, 0.0  ;;  %v734_v63 = vadd.f32 %v733_v45, %v508_v61 }
 0x12f   : > { %906 = vst [vmem:[%s1844_s16 + $0x68] sm:$0xff] %v874_v59  ;;  %v844_v1 = vadd.f32 %v1838_v53, %v739_v60 }
 0x130   : > { %905 = vst [vmem:[%s1844_s16 + $0x60] sm:$0xff] %v873_v62  ;;  %v843_v3 = vadd.f32 %v1838_v53, %v734_v63  ;;  %v1207_v4 = vpop.f32.mrb[16].mxu1  ;;  %v1296_v20 = vpop.f32.mrb[22].mxu0 }
 0x131   : > { %v876_v5 = vmax.f32 %v844_v1, 0.0  ;;  %v749_v6 = vadd.f32 %v1287_v54, %v1207_v4  ;;  %v518_v7 = vpop.f32.mrb[17].mxu1  ;;  %v773_v22 = vpop.f32.mrb[23].mxu0 }
 0x132   : > { %v875_v8 = vmax.f32 %v843_v3, 0.0  ;;  %v744_v9 = vadd.f32 %v743_v56, %v518_v7 }
 0x133   : > { %908 = vst [vmem:[%s1844_s16 + $0x78] sm:$0xff] %v876_v5  ;;  %v846_v11 = vadd.f32 %v1838_v53, %v749_v6 }
 0x134   : > { %907 = vst [vmem:[%s1844_s16 + $0x70] sm:$0xff] %v875_v8  ;;  %v845_v13 = vadd.f32 %v1838_v53, %v744_v9  ;;  %v1210_v14 = vpop.f32.mrb[18].mxu1  ;;  %v1299_v30 = vpop.f32.mrb[24].mxu0 }
 0x135   : > { %v878_v15 = vmax.f32 %v846_v11, 0.0  ;;  %v759_v16 = vadd.f32 %v1290_v0, %v1210_v14  ;;  %v528_v17 = vpop.f32.mrb[19].mxu1  ;;  %v783_v32 = vpop.f32.mrb[25].mxu0 }
 0x136   : > { %v877_v18 = vmax.f32 %v845_v13, 0.0  ;;  %v754_v19 = vadd.f32 %v753_v2, %v528_v17 }
 0x137   : > { %910 = vst [vmem:[%s1844_s16 + $0x88] sm:$0xff] %v878_v15  ;;  %v848_v21 = vadd.f32 %v1838_v53, %v759_v16 }
 0x138   : > { %909 = vst [vmem:[%s1844_s16 + $0x80] sm:$0xff] %v877_v18  ;;  %v847_v23 = vadd.f32 %v1838_v53, %v754_v19  ;;  %v1213_v24 = vpop.f32.mrb[20].mxu1  ;;  %v1302_v40 = vpop.f32.mrb[26].mxu0 }
 0x139   : > { %v880_v25 = vmax.f32 %v848_v21, 0.0  ;;  %v769_v26 = vadd.f32 %v1293_v10, %v1213_v24  ;;  %v538_v27 = vpop.f32.mrb[21].mxu1  ;;  %v793_v42 = vpop.f32.mrb[27].mxu0 }
 0x13a   : > { %v879_v28 = vmax.f32 %v847_v23, 0.0  ;;  %v764_v29 = vadd.f32 %v763_v12, %v538_v27 }
 0x13b   : > { %912 = vst [vmem:[%s1844_s16 + $0x98] sm:$0xff] %v880_v25  ;;  %v850_v31 = vadd.f32 %v1838_v53, %v769_v26 }
 0x13c   : > { %911 = vst [vmem:[%s1844_s16 + $0x90] sm:$0xff] %v879_v28  ;;  %v849_v33 = vadd.f32 %v1838_v53, %v764_v29  ;;  %v1216_v34 = vpop.f32.mrb[22].mxu1  ;;  %v1305_v50 = vpop.f32.mrb[28].mxu0 }
 0x13d   : > { %v882_v35 = vmax.f32 %v850_v31, 0.0  ;;  %v779_v36 = vadd.f32 %v1296_v20, %v1216_v34  ;;  %v548_v37 = vpop.f32.mrb[23].mxu1  ;;  %v803_v52 = vpop.f32.mrb[29].mxu0 }
 0x13e   : > { %v881_v38 = vmax.f32 %v849_v33, 0.0  ;;  %v774_v39 = vadd.f32 %v773_v22, %v548_v37 }
 0x13f   : > { %914 = vst [vmem:[%s1844_s16 + $0xa8] sm:$0xff] %v882_v35  ;;  %v852_v41 = vadd.f32 %v1838_v53, %v779_v36 }
 0x140   : > { %913 = vst [vmem:[%s1844_s16 + $0xa0] sm:$0xff] %v881_v38  ;;  %v851_v43 = vadd.f32 %v1838_v53, %v774_v39  ;;  %v1219_v44 = vpop.f32.mrb[24].mxu1  ;;  %v1308_v61 = vpop.f32.mrb[30].mxu0 }
 0x141   : > { %v884_v45 = vmax.f32 %v852_v41, 0.0  ;;  %v789_v46 = vadd.f32 %v1299_v30, %v1219_v44  ;;  %v558_v47 = vpop.f32.mrb[25].mxu1  ;;  %v813_v63 = vpop.f32.mrb[31].mxu0 }
 0x142   : > { %v883_v48 = vmax.f32 %v851_v43, 0.0  ;;  %v784_v49 = vadd.f32 %v783_v32, %v558_v47 }
 0x143   : > { %916 = vst [vmem:[%s1844_s16 + $0xb8] sm:$0xff] %v884_v45  ;;  %v854_v51 = vadd.f32 %v1838_v53, %v789_v46 }
 0x144   : > { %915 = vst [vmem:[%s1844_s16 + $0xb0] sm:$0xff] %v883_v48  ;;  %v853_v54 = vadd.f32 %v1838_v53, %v784_v49  ;;  %v1222_v55 = vpop.f32.mrb[26].mxu1 }
 0x145   : > { %v886_v56 = vmax.f32 %v854_v51, 0.0  ;;  %v799_v57 = vadd.f32 %v1302_v40, %v1222_v55  ;;  %v568_v58 = vpop.f32.mrb[27].mxu1 }
 0x146   : > { %v885_v59 = vmax.f32 %v853_v54, 0.0  ;;  %v794_v60 = vadd.f32 %v793_v42, %v568_v58 }
 0x147   : > { %918 = vst [vmem:[%s1844_s16 + $0xc8] sm:$0xff] %v886_v56  ;;  %v856_v62 = vadd.f32 %v1838_v53, %v799_v57 }
 0x148   : > { %917 = vst [vmem:[%s1844_s16 + $0xc0] sm:$0xff] %v885_v59  ;;  %v855_v0 = vadd.f32 %v1838_v53, %v794_v60  ;;  %v1225_v1 = vpop.f32.mrb[28].mxu1 }
 0x149   : > { %v888_v2 = vmax.f32 %v856_v62, 0.0  ;;  %v809_v3 = vadd.f32 %v1305_v50, %v1225_v1  ;;  %v578_v4 = vpop.f32.mrb[29].mxu1 }
 0x14a   : > { %v887_v5 = vmax.f32 %v855_v0, 0.0  ;;  %v804_v6 = vadd.f32 %v803_v52, %v578_v4 }
 0x14b   : > { %920 = vst [vmem:[%s1844_s16 + $0xd8] sm:$0xff] %v888_v2  ;;  %v858_v7 = vadd.f32 %v1838_v53, %v809_v3 }
 0x14c   : > { %919 = vst [vmem:[%s1844_s16 + $0xd0] sm:$0xff] %v887_v5  ;;  %v857_v8 = vadd.f32 %v1838_v53, %v804_v6  ;;  %v1228_v9 = vpop.f32.mrb[30].mxu1 }
 0x14d   : > { %v890_v10 = vmax.f32 %v858_v7, 0.0  ;;  %v819_v11 = vadd.f32 %v1308_v61, %v1228_v9  ;;  %v588_v12 = vpop.f32.mrb[31].mxu1 }
 0x14e   : > { %v889_v13 = vmax.f32 %v857_v8, 0.0  ;;  %v814_v14 = vadd.f32 %v813_v63, %v588_v12 }
 0x14f   : > { %922 = vst [vmem:[%s1844_s16 + $0xe8] sm:$0xff] %v890_v10  ;;  %v860_v15 = vadd.f32 %v1838_v53, %v819_v11 }
 0x150   : > { %921 = vst [vmem:[%s1844_s16 + $0xe0] sm:$0xff] %v889_v13  ;;  %v859_v16 = vadd.f32 %v1838_v53, %v814_v14 }
 0x151   : > { %v892_v17 = vmax.f32 %v860_v15, 0.0 }
 0x152   : > { %v891_v18 = vmax.f32 %v859_v16, 0.0 }
 0x153   : > { %924 = vst [vmem:[%s1844_s16 + $0xf8] sm:$0xff] %v892_v17 }
 0x154   : > { %923 = vst [vmem:[%s1844_s16 + $0xf0] sm:$0xff] %v891_v18 }
 0x155   : > { %1475 = shalt.err (!%p1472_p5)
}
 0x156   : > { %s1476_s12 = scalar_lea.hbm %s1911_s8, 4096  ;;  %s1480_s14 = scalar_lea.hbm %s1970_s5, 8192 }
 0x157   : > { %p1477_p6 = scmp.ne.s32.totalorder %s1911_s8, %s1476_s12  ;;  %p1481_p10 = scmp.lt.u32.totalorder %s1911_s8, %s1970_s5 }
 0x158   : > { %p1482_p11 = scmp.lt.u32.totalorder %s1480_s14, %s1476_s12  ;;  %p1484_p13 = scmp.lt.u32.totalorder %s1476_s12, %s1911_s8 }
 0x159   : > { %p1478_p7 = pnand %p1477_p6, %p1615_p4 }
 0x15a   : > { %p1483_p12 = por %p1482_p11, %p1481_p10 }
 0x15b   : > { %p1479_p9 = pneg %p1478_p7 }
 0x15c   : > { %p1485_p0 = por %p1484_p13, %p1483_p12 }
 0x15e   : > { %p1486_p1 = pnand %p1485_p0, %p1479_p9 }
 0x160   : > { %1489 = shalt.err (!%p1486_p1)
}
 0x161   : > { %s1543_s17 = smov 128   ;;  %s1544_s27 = smov 8  }
 0x162   : > { %1405 = dma.vmem_to_hbm [thread:$0]  (%p1615_p4), %s1913_s25, 4096, %s1911_s8, %s1919_s21, %s1543_s17, %s1543_s17, %s1544_s27  }
 0x163 PF: > { %p1411_p2 = scmp.ge.s32.totalorder %s1540_s23, 2  ;;  %s956_s7 = sand.u32 1, %s1520_s18  }
 0x164   : > { %s957_s9 = scalar_lea.sflag [#allocation3], %s956_s7 }
 0x165   : > { %p1408_p3 = pnand %p1411_p2, %p1622_p8 }
 0x167   : > { %1515 = dma.done.wait (!%p1408_p3), %s957_s9, 4096  }
 0x168   : > { %1517 = vsyncadd (!%p1408_p3), %s957_s9, 4294963200  ;;  %s18_s23 = sadd.s32 1, %s1540_s23   ;;  %s1973_s18 = smov %s1524_s19 }
 0x169   : > { %p15_p5 = scmp.ge.s32.totalorder %s18_s23, 4   ;;  %s1974_s19 = smov %s1528_s20 }
 0x16a   : > { %s1975_s20 = smov %s1628_s6  ;;  %s1976_s21 = smov %s1536_s22 }
 0x16b   : > { %s1977_s22 = smov %s1979_s26  ;;  %17 = sbr.rel (!%p15_p5) target bundleno = 4 (0x4), region = 79 }
 0x172   :  { %962 = vsyncpa [#allocation3], 1 }
 0x173   :  { %964 = vsyncpa [#allocation3 + $0x1], 1 }

</bundles_post_ra>
